<compile_context>
chip_gen: v7x
topology: tpu7x:2x2x1
jax: 0.10.0
libtpu: 0.0.40
codegen_flags: <defaults>
</compile_context>

<pallas_src>
import jax
import jax.numpy as jnp
from jax import lax
from jax.experimental import pallas as pl
from jax.experimental.pallas import tpu as pltpu  # noqa: F401  (TPU backend symbols)


def relation_kernel(q_ref, s_ref, o_ref):
    # q_ref: (CQ, dim)  s_ref: (C, dim)  o_ref: (CQ, C)
    # Single MXU matmul: contract q's last dim with s's last dim (== q @ s.T)
    # without an explicit transpose of s.
    o_ref[...] = lax.dot_general(
        q_ref[...],
        s_ref[...],
        dimension_numbers=(((1,), (1,)), ((), ())),
        preferred_element_type=jnp.float32,
    ).astype(o_ref.dtype)


def relation_module_forward(q, s, M):
    """q: (CQ, dim) f32, s: (C, dim) f32, M: (dim, dim, h) f32 -> (CQ, C, h) f32.

    M is accepted to mirror the module's parameters but is intentionally unused:
    in the reference forward its matmul result is shadowed before use.
    """
    CQ, dim = q.shape
    C, dim_s = s.shape
    assert dim == dim_s, (dim, dim_s)
    h = M.shape[-1]

    qs = pl.pallas_call(
        relation_kernel,
        out_shape=jax.ShapeDtypeStruct((CQ, C), jnp.float32),
        in_specs=[
            pl.BlockSpec((CQ, dim), lambda: (0, 0)),  # q, whole array
            pl.BlockSpec((C, dim), lambda: (0, 0)),   # s, whole array
        ],
        out_specs=pl.BlockSpec((CQ, C), lambda: (0, 0)),
        cost_estimate=pl.CostEstimate(
            flops=2 * CQ * C * dim,
            transcendentals=0,
            bytes_accessed=4 * (CQ * dim + C * dim + CQ * C),
        ),
    )(q, s)

    # torch.stack([qs] * h, dim=2) -> (CQ, C, h); every slice is identical.
    return jnp.broadcast_to(qs[:, :, None], (CQ, C, h))


if __name__ == "__main__":
    h = 4
    feature_dim = 32
    CQ = 8   # number of query examples
    C = 4    # number of classes / support prototypes

    key = jax.random.PRNGKey(0)
    kq, ks, km = jax.random.split(key, 3)
    q = jax.random.normal(kq, (CQ, feature_dim), dtype=jnp.float32)
    s = jax.random.normal(ks, (C, feature_dim), dtype=jnp.float32)
    # Module parameter M (feature_dim, feature_dim, h); dead w.r.t. the output.
    M = jax.random.normal(km, (feature_dim, feature_dim, h), dtype=jnp.float32)

    out = relation_module_forward(q, s, M)
    out = jax.block_until_ready(out)

    # Pure-JAX reference of the PyTorch forward (each h-slice is q @ s.T).
    ref = jnp.stack([q @ s.T for _ in range(h)], axis=2)

    assert out.shape == (CQ, C, h), out.shape
    assert jnp.allclose(out, ref, atol=1e-5, rtol=1e-5)
    print("KERNEL_OK")
</pallas_src>

<mosaic_0001>
module attributes {stable_mosaic.version = 11 : i64} {
  func.func @relation_kernel(%arg0: memref<8x32xf32, #tpu.memory_space<vmem>>, %arg1: memref<4x32xf32, #tpu.memory_space<vmem>>, %arg2: memref<8x4xf32, #tpu.memory_space<vmem>>) attributes {dimension_semantics = [], scalar_prefetch = 0 : i64, scratch_operands = 0 : i64, tpu.core_type = #tpu.core_type<tc>} {
    %c0 = arith.constant 0 : index
    %c0_0 = arith.constant 0 : index
    %0 = vector.load %arg0[%c0, %c0_0] : memref<8x32xf32, #tpu.memory_space<vmem>>, vector<8x32xf32>
    %c0_1 = arith.constant 0 : index
    %c0_2 = arith.constant 0 : index
    %1 = vector.load %arg1[%c0_1, %c0_2] : memref<4x32xf32, #tpu.memory_space<vmem>>, vector<4x32xf32>
    %cst = arith.constant dense<0.000000e+00> : vector<8x4xf32>
    %2 = tpu.matmul %0, %1, %cst {dimension_numbers = #tpu.dot_dimension_numbers<[1], [1], [0], [0], [0, 0, 1, 0], [], []>} : vector<8x32xf32>, vector<4x32xf32>, vector<8x4xf32> -> vector<8x4xf32>
    %c0_3 = arith.constant 0 : index
    %c0_4 = arith.constant 0 : index
    %3 = vector.load %arg2[%c0_3, %c0_4] : memref<8x4xf32, #tpu.memory_space<vmem>>, vector<8x4xf32>
    tpu.vector_store %arg2[%c0_3, %c0_4], %2 {strides = array<i32>} : memref<8x4xf32, #tpu.memory_space<vmem>>, vector<8x4xf32>,
    return
  }
}

</mosaic_0001>

<bundles_post_ra>
// kernel: tpu_custom_call.1
= control target key start
LH: loop header
LB: loop body
LE: loop exit
PB: predicated region body
PF: predicated region fallthrough
CT: control target
= control target key end

     0   :  { %7 = vsyncpa [#allocation3], 0  ;;  %s229_s0 = inlined_call_operand.hbm [shape: f32[8,32], index: 0, kind: input, shape index: {}]   ;;  %s230_s1 = inlined_call_operand.hbm [shape: f32[4,32], index: 1, kind: input, shape index: {}]   ;;  %s231_s2 = inlined_call_operand.vmem [shape: f32[8,4], index: 2, kind: output, shape index: {}]  }
   0x1   :  { %8 = vsyncpa [#allocation5], 0  ;;  %s183_s9 = smov [#allocation2]   ;;  %s184_s11 = smov [#allocation4]  }
   0x2   :  { %s15_s10 = sshll.u32 %s183_s9, 4  ;;  %s25_s12 = sshll.u32 %s184_s11, 4  ;;  %s16_s10 = int_to_ptr.vmem [resolvable:$true] %s15_s10  ;;  %s26_s12 = int_to_ptr.vmem [resolvable:$true] %s25_s12 }
   0x3   :  { %s135_s15 = scalar_lea.hbm %s229_s0, 128 }
   0x4   :  { %p136_p0 = scmp.ne.s32.totalorder %s229_s0, %s135_s15  ;;  %p139_p1 = scmp.lt.u32.totalorder %s135_s15, %s229_s0 }
   0x6   :  { %p141_p2 = pnand %p139_p1, %p136_p0 }
   0x8   :  { %144 = shalt.err (!%p141_p2)
}
   0x9   :  { %s145_s20 = scalar_lea.vmem %s16_s10, 128  ;;  %p150_p4 = scmp.lt.s32.totalorder %s16_s10, %s16_s10 }
   0xa   :  { %p146_p3 = scmp.ne.s32.totalorder %s16_s10, %s145_s20  ;;  %p151_p5 = scmp.lt.s32.totalorder %s145_s20, %s145_s20 }
   0xc   :  { %p152_p6 = por %p151_p5, %p150_p4 }
   0xe   :  { %p153_p7 = pnand %p152_p6, %p146_p3 }
  0x10   :  { %156 = shalt.err (!%p153_p7)
}
  0x11   :  { %18 = dma.hbm_to_vmem [thread:$0]  %s229_s0, 128, %s16_s10, [#allocation3]  }
  0x12   :  { %s157_s25 = scalar_lea.hbm %s230_s1, 64 }
  0x13   :  { %p158_p8 = scmp.ne.s32.totalorder %s230_s1, %s157_s25  ;;  %p161_p9 = scmp.lt.u32.totalorder %s157_s25, %s230_s1 }
  0x15   :  { %p163_p10 = pnand %p161_p9, %p158_p8 }
  0x17   :  { %166 = shalt.err (!%p163_p10)
}
  0x18   :  { %s167_s30 = scalar_lea.vmem %s26_s12, 64  ;;  %p172_p12 = scmp.lt.s32.totalorder %s26_s12, %s26_s12 }
  0x19   :  { %p168_p11 = scmp.ne.s32.totalorder %s26_s12, %s167_s30  ;;  %p173_p13 = scmp.lt.s32.totalorder %s167_s30, %s167_s30 }
  0x1b   :  { %p174_p0 = por %p173_p13, %p172_p12 }
  0x1d   :  { %p175_p1 = pnand %p174_p0, %p168_p11 }
  0x1f   :  { %178 = shalt.err (!%p175_p1)
}
  0x20   :  { %28 = dma.hbm_to_vmem [thread:$0]  %s230_s1, 64, %s26_s12, [#allocation5]  }
  0x21   :  { %179 = dma.done.wait [#allocation3], 128  }
  0x22   :  { %180 = vsyncadd [#allocation3], 4294967168 }
  0x23   :  { %181 = dma.done.wait [#allocation5], 64  }
  0x24   :  { %182 = vsyncadd [#allocation5], 4294967232  ;;  %v185_v0 = vmov 0.0   ;;  %vm186_vm0 = vmmov 0   ;;  %vm37_vm1 = vcmask 261120   ;;  %v35_v2 = vld [vmem:[#allocation2] sm:$0xff] }
  0x25   :  { %126 = vmatprep.subr.mxu0 %v185_v0  ;;  %128 = vmatprep.mubr.msk.f32.mxu0 %vm186_vm0, %v185_v0  ;;  %v36_v1 = vld [vmem:[#allocation4] sm:$0xf]  ;;  %vm114_vm2 = vcmask 31744  }
  0x26   :  { %127 = vmatpush3.xpose.msk.msra.mxu0 %vm37_vm1, %v36_v1 }
  0x29   :  { %129 = vmatmul.mubr.msk.f32.vlgmr.msra.gmra.mrb[0].mxu0 %vm37_vm1, %v35_v2 }
  0xfc   :  { %v110_v3 = vpop.f32.mrb[0].mxu0 }
  0xfd   :  { %115 = vst.msk [vmem:[%s231_s2] sm:$0xff] %vm114_vm2, %v110_v3  ;;  %v130_v4 = vpop.f32.mrb[1].mxu0 }
  0xfe   :  { %120 = vsyncpa [#allocation3], 1 }
  0xff   :  { %121 = vsyncpa [#allocation5], 1 }

</bundles_post_ra>
